<compile_context>
chip_gen: v6e
topology: v6e:2x2x1
jax: 0.10.0
libtpu: 0.0.40
codegen_flags: <defaults>
</compile_context>

<pallas_src>
import math

import numpy as np
import jax
import jax.numpy as jnp
from jax import lax
from jax.experimental import pallas as pl
from jax.experimental.pallas import tpu as pltpu  # noqa: F401  (TPU backend)

# ---- config (small, consistent with the module) ----
B, S, H = 2, 8, 32          # batch, seq_len, hidden_size
NH = 4                      # num_attention_heads
HD = H // NH                # attention_head_size
INTER = 64                  # intermediate_size
EPS = 1e-12                 # layer_norm_eps
SCALE = 1.0 / math.sqrt(HD)
SQRT2 = math.sqrt(2.0)

BS = B * S                  # 16 flattened (batch, seq) rows
ROWS = NH * BS              # 64 head-replicated rows for the batched attention
LANES = 128                 # TPU lane width -> lane-dense output slab

# ---- packed-parameter slab layouts (single source of truth) ----
_W_PARTS = (("wqkv", 3 * H), ("wo", H), ("w1", INTER), ("w2t", INTER))
_V_PARTS = (("bqkv", 3 * H), ("bo", H), ("g1", H), ("be1", H),
            ("b1", INTER), ("b2", H), ("g2", H), ("be2", H))


def _offsets(parts):
    off, total = {}, 0
    for name, size in parts:
        off[name] = (total, size)
        total += size
    return off, total


W_OFF, W_TOTAL = _offsets(_W_PARTS)     # (H, 256) weight slab
V_OFF, V_TOTAL = _offsets(_V_PARTS)     # (1, 352) bias / LayerNorm slab


def _take(ref, layout, name):
    start, size = layout[name]
    return ref[:, start:start + size]    # static slice: zero-cost view + load


def _layernorm(x, gamma, beta):
    # One-pass variance (E[x^2] - mu^2): the two cross-lane reductions are
    # independent and can overlap on the XLU.
    mu = jnp.mean(x, axis=-1, keepdims=True)
    var = jnp.maximum(jnp.mean(x * x, axis=-1, keepdims=True) - mu * mu, 0.0)
    return (x - mu) * lax.rsqrt(var + EPS) * gamma + beta


# ---------------- fused Pallas kernel ----------------
def bert_layer_kernel(x_ref, w_ref, vec_ref, msk_ref, o_ref):
    x = x_ref[...]                                              # (BS, H)

    # ---- unpack packed slabs (static slices) ----
    w_qkv = _take(w_ref, W_OFF, "wqkv")                         # (H, 3H), wq pre-scaled
    w_o = _take(w_ref, W_OFF, "wo")                             # (H, H)
    w_1 = _take(w_ref, W_OFF, "w1")                             # (H, INTER)
    w_2t = _take(w_ref, W_OFF, "w2t")                           # (H, INTER) == w2.T

    b_qkv = _take(vec_ref, V_OFF, "bqkv")
    b_o = _take(vec_ref, V_OFF, "bo")
    g1 = _take(vec_ref, V_OFF, "g1")
    be1 = _take(vec_ref, V_OFF, "be1")
    b_1 = _take(vec_ref, V_OFF, "b1")
    b_2 = _take(vec_ref, V_OFF, "b2")
    g2 = _take(vec_ref, V_OFF, "g2")
    be2 = _take(vec_ref, V_OFF, "be2")

    head_mask = msk_ref[:, 0:H]                                 # (ROWS, H)  {0,1}
    score_bias = msk_ref[:, H:H + BS]                           # (ROWS, BS) {0,-1e30}

    # ---- fused QKV projection: one MXU call, 96 output lanes ----
    qkv = jnp.dot(x, w_qkv, preferred_element_type=jnp.float32) + b_qkv
    q = qkv[:, 0:H]                     # pre-scaled by 1/sqrt(HD) via wq/bq
    k = qkv[:, H:2 * H]
    v = qkv[:, 2 * H:3 * H]

    # ---- batched attention, heads packed along rows (r = h*BS + b*S + s) ----
    q_rep = jnp.concatenate([q] * NH, axis=0) * head_mask        # (ROWS, H)
    scores = jnp.einsum("rd,kd->rk", q_rep, k,
                        preferred_element_type=jnp.float32) + score_bias
    m = jnp.max(scores, axis=-1, keepdims=True)
    e = jnp.exp(scores - m)
    probs = e / jnp.sum(e, axis=-1, keepdims=True)               # exact divide
    ctx_rep = jnp.dot(probs, v, preferred_element_type=jnp.float32) * head_mask
    ctx = (ctx_rep[0:BS] + ctx_rep[BS:2 * BS]) + \
          (ctx_rep[2 * BS:3 * BS] + ctx_rep[3 * BS:4 * BS])       # (BS, H)

    # ---- BertSelfOutput: dense + residual + LayerNorm (dropout = identity) ----
    attn = jnp.dot(ctx, w_o, preferred_element_type=jnp.float32) + b_o
    h1 = _layernorm(attn + x, g1, be1)

    # ---- BertIntermediate (exact GELU) + BertOutput: dense + res + LN ----
    inter = jnp.dot(h1, w_1, preferred_element_type=jnp.float32) + b_1
    inter = 0.5 * inter * (1.0 + lax.erf(inter / SQRT2))
    out = jnp.einsum("ri,hi->rh", inter, w_2t,
                     preferred_element_type=jnp.float32) + b_2
    y = _layernorm(out + h1, g2, be2)                            # (BS, H)

    # ---- lane-dense store: (BS, 128) slab, payload in lanes [0, H) ----
    o_ref[...] = jnp.concatenate(
        [y, jnp.zeros((BS, LANES - H), jnp.float32)], axis=1)


# ---------------- constant masks (hoisted out of the kernel) ----------------
def _constant_mask_slab():
    rows = np.arange(ROWS)
    head_mask = (rows[:, None] // BS == np.arange(H)[None, :] // HD)
    same_batch = ((rows[:, None] // S) % B == np.arange(BS)[None, :] // S)
    score_bias = np.where(same_batch, 0.0, -1e30)
    return np.concatenate([head_mask.astype(np.float32),
                           score_bias.astype(np.float32)], axis=1)  # (ROWS, H+BS)


_MASK_SLAB_NP = _constant_mask_slab()


# ---------------- wrapper ----------------
def bert_layer_pallas(x, p):
    x_flat = x.reshape(BS, H)

    # Pack 13 small operands into 3 slabs -> 3 input DMAs.  SCALE folded into wq/bq.
    w_slab = jnp.concatenate(
        [p["wq"] * SCALE, p["wk"], p["wv"], p["wo"], p["w1"], p["w2"].T], axis=1)
    assert w_slab.shape == (H, W_TOTAL)
    vec_slab = jnp.concatenate(
        [p["bq"] * SCALE, p["bk"], p["bv"], p["bo"], p["ln1_g"], p["ln1_b"],
         p["b1"], p["b2"], p["ln2_g"], p["ln2_b"]], axis=1)
    assert vec_slab.shape == (1, V_TOTAL)
    mask_slab = jnp.asarray(_MASK_SLAB_NP)

    # Grid-less call: every operand is one whole-array VMEM block (weights
    # resident once, no per-step pipeline buffers), output stored in one shot.
    out_padded = pl.pallas_call(
        bert_layer_kernel,
        out_shape=jax.ShapeDtypeStruct((BS, LANES), jnp.float32),
    )(x_flat, w_slab, vec_slab, mask_slab)
    return out_padded[:, :H].reshape(B, S, H)


# ---------------- pure-JAX reference (PyTorch eval-mode semantics) ----------------
def _layernorm_ref(x, gamma, beta):
    mu = jnp.mean(x, axis=-1, keepdims=True)
    var = jnp.mean((x - mu) ** 2, axis=-1, keepdims=True)
    return (x - mu) * lax.rsqrt(var + EPS) * gamma + beta


def bert_layer_ref(x, p):
    hi = lax.Precision.HIGHEST

    def lin(h, w, b):
        return jnp.dot(h, w, precision=hi) + b

    q = lin(x, p["wq"], p["bq"]).reshape(B, S, NH, HD).transpose(0, 2, 1, 3)
    k = lin(x, p["wk"], p["bk"]).reshape(B, S, NH, HD).transpose(0, 2, 1, 3)
    v = lin(x, p["wv"], p["bv"]).reshape(B, S, NH, HD).transpose(0, 2, 1, 3)
    scores = jnp.einsum("bhqd,bhkd->bhqk", q, k, precision=hi) * SCALE
    probs = jax.nn.softmax(scores, axis=-1)
    ctx = jnp.einsum("bhqk,bhkd->bhqd", probs, v,
                     precision=hi).transpose(0, 2, 1, 3).reshape(B, S, H)
    attn_out = _layernorm_ref(lin(ctx, p["wo"], p["bo"]) + x, p["ln1_g"], p["ln1_b"])
    inter = jax.nn.gelu(lin(attn_out, p["w1"], p["b1"]), approximate=False)
    return _layernorm_ref(lin(inter, p["w2"], p["b2"]) + attn_out,
                          p["ln2_g"], p["ln2_b"])


def make_params(key):
    ks = jax.random.split(key, 16)
    w = lambda k, shape: (0.02 * jax.random.normal(k, shape)).astype(jnp.float32)
    b = lambda k, n: (0.1 * jax.random.normal(k, (1, n))).astype(jnp.float32)
    return {
        "wq": w(ks[0], (H, H)), "bq": b(ks[1], H),
        "wk": w(ks[2], (H, H)), "bk": b(ks[3], H),
        "wv": w(ks[4], (H, H)), "bv": b(ks[5], H),
        "wo": w(ks[6], (H, H)), "bo": b(ks[7], H),
        "ln1_g": 1.0 + b(ks[8], H), "ln1_b": b(ks[9], H),
        "w1": w(ks[10], (H, INTER)), "b1": b(ks[11], INTER),
        "w2": w(ks[12], (INTER, H)), "b2": b(ks[13], H),
        "ln2_g": 1.0 + b(ks[14], H), "ln2_b": b(ks[15], H),
    }


if __name__ == "__main__":
    key = jax.random.PRNGKey(0)
    k_x, k_p = jax.random.split(key)
    x = jax.random.normal(k_x, (B, S, H), dtype=jnp.float32)
    params = make_params(k_p)

    # TODO(synk): attention_mask / head_mask / cross-attention branches are not
    # exercised (module defaults: None, is_decoder=False, add_cross_attention=False).
    out = jax.block_until_ready(bert_layer_pallas(x, params))
    ref = bert_layer_ref(x, params)
    assert out.shape == (B, S, H)
    # Tightened from 1e-3 after reverting the approximate EUP reciprocal; the
    # remaining slack covers Mosaic's multi-pass f32 MXU emulation vs XLA
    # HIGHEST-precision rounding differences.
    assert jnp.allclose(out, ref, rtol=5e-4, atol=5e-4), "mismatch vs JAX reference"
    print("KERNEL_OK")
</pallas_src>

<mosaic_0001>
module attributes {stable_mosaic.version = 11 : i64} {
  func.func @bert_layer_kernel(%arg0: memref<16x32xf32, #tpu.memory_space<vmem>>, %arg1: memref<32x256xf32, #tpu.memory_space<vmem>>, %arg2: memref<1x352xf32, #tpu.memory_space<vmem>>, %arg3: memref<64x48xf32, #tpu.memory_space<vmem>>, %arg4: memref<16x128xf32, #tpu.memory_space<vmem>>) attributes {dimension_semantics = [], scalar_prefetch = 0 : i64, scratch_operands = 0 : i64, tpu.core_type = #tpu.core_type<tc>} {
    %c0 = arith.constant 0 : index
    %c0_0 = arith.constant 0 : index
    %0 = vector.load %arg0[%c0, %c0_0] : memref<16x32xf32, #tpu.memory_space<vmem>>, vector<16x32xf32>
    %c0_1 = arith.constant 0 : index
    %c0_2 = arith.constant 0 : index
    %1 = vector.load %arg1[%c0_1, %c0_2] : memref<32x256xf32, #tpu.memory_space<vmem>>, vector<32x96xf32>
    %c0_3 = arith.constant 0 : index
    %c96 = arith.constant 96 : index
    %2 = vector.load %arg1[%c0_3, %c96] : memref<32x256xf32, #tpu.memory_space<vmem>>, vector<32x32xf32>
    %c0_4 = arith.constant 0 : index
    %c128 = arith.constant 128 : index
    %3 = vector.load %arg1[%c0_4, %c128] : memref<32x256xf32, #tpu.memory_space<vmem>>, vector<32x64xf32>
    %c0_5 = arith.constant 0 : index
    %c192 = arith.constant 192 : index
    %4 = vector.load %arg1[%c0_5, %c192] : memref<32x256xf32, #tpu.memory_space<vmem>>, vector<32x64xf32>
    %c0_6 = arith.constant 0 : index
    %c0_7 = arith.constant 0 : index
    %5 = vector.load %arg2[%c0_6, %c0_7] : memref<1x352xf32, #tpu.memory_space<vmem>>, vector<1x96xf32>
    %c0_8 = arith.constant 0 : index
    %c96_9 = arith.constant 96 : index
    %6 = vector.load %arg2[%c0_8, %c96_9] : memref<1x352xf32, #tpu.memory_space<vmem>>, vector<1x32xf32>
    %c0_10 = arith.constant 0 : index
    %c128_11 = arith.constant 128 : index
    %7 = vector.load %arg2[%c0_10, %c128_11] : memref<1x352xf32, #tpu.memory_space<vmem>>, vector<1x32xf32>
    %c0_12 = arith.constant 0 : index
    %c160 = arith.constant 160 : index
    %8 = vector.load %arg2[%c0_12, %c160] : memref<1x352xf32, #tpu.memory_space<vmem>>, vector<1x32xf32>
    %c0_13 = arith.constant 0 : index
    %c192_14 = arith.constant 192 : index
    %9 = vector.load %arg2[%c0_13, %c192_14] : memref<1x352xf32, #tpu.memory_space<vmem>>, vector<1x64xf32>
    %c0_15 = arith.constant 0 : index
    %c256 = arith.constant 256 : index
    %10 = vector.load %arg2[%c0_15, %c256] : memref<1x352xf32, #tpu.memory_space<vmem>>, vector<1x32xf32>
    %c0_16 = arith.constant 0 : index
    %c288 = arith.constant 288 : index
    %11 = vector.load %arg2[%c0_16, %c288] : memref<1x352xf32, #tpu.memory_space<vmem>>, vector<1x32xf32>
    %c0_17 = arith.constant 0 : index
    %c320 = arith.constant 320 : index
    %12 = vector.load %arg2[%c0_17, %c320] : memref<1x352xf32, #tpu.memory_space<vmem>>, vector<1x32xf32>
    %c0_18 = arith.constant 0 : index
    %c0_19 = arith.constant 0 : index
    %13 = vector.load %arg3[%c0_18, %c0_19] : memref<64x48xf32, #tpu.memory_space<vmem>>, vector<64x32xf32>
    %c0_20 = arith.constant 0 : index
    %c32 = arith.constant 32 : index
    %14 = vector.load %arg3[%c0_20, %c32] : memref<64x48xf32, #tpu.memory_space<vmem>>, vector<64x16xf32>
    %cst = arith.constant dense<0.000000e+00> : vector<16x96xf32>
    %15 = tpu.matmul %0, %1, %cst {dimension_numbers = #tpu.dot_dimension_numbers<[1], [0], [0], [1], [0, 0, 1, 1], [], []>} : vector<16x32xf32>, vector<32x96xf32>, vector<16x96xf32> -> vector<16x96xf32>
    %16 = vector.broadcast %5 : vector<1x96xf32> to vector<16x96xf32>
    %17 = arith.addf %15, %16 : vector<16x96xf32>
    %18 = vector.extract_strided_slice %17 {offsets = [0, 0], sizes = [16, 32], strides = [1, 1]} : vector<16x96xf32> to vector<16x32xf32>
    %19 = vector.extract_strided_slice %17 {offsets = [0, 32], sizes = [16, 32], strides = [1, 1]} : vector<16x96xf32> to vector<16x32xf32>
    %20 = vector.extract_strided_slice %17 {offsets = [0, 64], sizes = [16, 32], strides = [1, 1]} : vector<16x96xf32> to vector<16x32xf32>
    %21 = tpu.concatenate %18, %18, %18, %18 in 0 : vector<16x32xf32>, vector<16x32xf32>, vector<16x32xf32>, vector<16x32xf32> -> vector<64x32xf32>
    %22 = arith.mulf %21, %13 : vector<64x32xf32>
    "tpu.trace_start"() <{level = 10 : i32, message = "rd,kd->rk"}> : () -> ()
    %cst_21 = arith.constant dense<0.000000e+00> : vector<64x16xf32>
    %23 = tpu.matmul %22, %19, %cst_21 {dimension_numbers = #tpu.dot_dimension_numbers<[1], [1], [0], [0], [0, 0, 1, 0], [], []>} : vector<64x32xf32>, vector<16x32xf32>, vector<64x16xf32> -> vector<64x16xf32>
    "tpu.trace_stop"() : () -> ()
    %24 = arith.addf %23, %14 : vector<64x16xf32>
    %cst_22 = arith.constant dense<0xFF800000> : vector<64xf32>
    %25 = vector.multi_reduction <maximumf>, %24, %cst_22 [1] : vector<64x16xf32> to vector<64xf32>
    %26 = vector.shape_cast %25 : vector<64xf32> to vector<64x1xf32>
    %27 = vector.broadcast %26 : vector<64x1xf32> to vector<64x16xf32>
    %28 = arith.subf %24, %27 : vector<64x16xf32>
    %29 = math.exp %28 : vector<64x16xf32>
    %cst_23 = arith.constant dense<0.000000e+00> : vector<64xf32>
    %30 = vector.multi_reduction <add>, %29, %cst_23 [1] : vector<64x16xf32> to vector<64xf32>
    %31 = vector.shape_cast %30 : vector<64xf32> to vector<64x1xf32>
    %32 = vector.broadcast %31 : vector<64x1xf32> to vector<64x16xf32>
    %33 = arith.divf %29, %32 : vector<64x16xf32>
    %cst_24 = arith.constant dense<0.000000e+00> : vector<64x32xf32>
    %34 = tpu.matmul %33, %20, %cst_24 {dimension_numbers = #tpu.dot_dimension_numbers<[1], [0], [0], [1], [0, 0, 1, 1], [], []>} : vector<64x16xf32>, vector<16x32xf32>, vector<64x32xf32> -> vector<64x32xf32>
    %35 = arith.mulf %34, %13 : vector<64x32xf32>
    %36 = vector.extract_strided_slice %35 {offsets = [0, 0], sizes = [16, 32], strides = [1, 1]} : vector<64x32xf32> to vector<16x32xf32>
    %37 = vector.extract_strided_slice %35 {offsets = [16, 0], sizes = [16, 32], strides = [1, 1]} : vector<64x32xf32> to vector<16x32xf32>
    %38 = arith.addf %36, %37 : vector<16x32xf32>
    %39 = vector.extract_strided_slice %35 {offsets = [32, 0], sizes = [16, 32], strides = [1, 1]} : vector<64x32xf32> to vector<16x32xf32>
    %40 = vector.extract_strided_slice %35 {offsets = [48, 0], sizes = [16, 32], strides = [1, 1]} : vector<64x32xf32> to vector<16x32xf32>
    %41 = arith.addf %39, %40 : vector<16x32xf32>
    %42 = arith.addf %38, %41 : vector<16x32xf32>
    %cst_25 = arith.constant dense<0.000000e+00> : vector<16x32xf32>
    %43 = tpu.matmul %42, %2, %cst_25 {dimension_numbers = #tpu.dot_dimension_numbers<[1], [0], [0], [1], [0, 0, 1, 1], [], []>} : vector<16x32xf32>, vector<32x32xf32>, vector<16x32xf32> -> vector<16x32xf32>
    %44 = vector.broadcast %6 : vector<1x32xf32> to vector<16x32xf32>
    %45 = arith.addf %43, %44 : vector<16x32xf32>
    %46 = arith.addf %45, %0 : vector<16x32xf32>
    %cst_26 = arith.constant dense<0.000000e+00> : vector<16xf32>
    %47 = vector.multi_reduction <add>, %46, %cst_26 [1] : vector<16x32xf32> to vector<16xf32>
    %48 = vector.shape_cast %47 : vector<16xf32> to vector<16x1xf32>
    %cst_27 = arith.constant 3.200000e+01 : f32
    %49 = vector.broadcast %cst_27 : f32 to vector<16x1xf32>
    %50 = arith.divf %48, %49 : vector<16x1xf32>
    %51 = arith.mulf %46, %46 : vector<16x32xf32>
    %cst_28 = arith.constant dense<0.000000e+00> : vector<16xf32>
    %52 = vector.multi_reduction <add>, %51, %cst_28 [1] : vector<16x32xf32> to vector<16xf32>
    %53 = vector.shape_cast %52 : vector<16xf32> to vector<16x1xf32>
    %cst_29 = arith.constant 3.200000e+01 : f32
    %54 = vector.broadcast %cst_29 : f32 to vector<16x1xf32>
    %55 = arith.divf %53, %54 : vector<16x1xf32>
    %56 = arith.mulf %50, %50 : vector<16x1xf32>
    %57 = arith.subf %55, %56 : vector<16x1xf32>
    %cst_30 = arith.constant 0.000000e+00 : f32
    %58 = vector.broadcast %cst_30 : f32 to vector<16x1xf32>
    %59 = arith.maximumf %57, %58 : vector<16x1xf32>
    %60 = vector.broadcast %50 : vector<16x1xf32> to vector<16x32xf32>
    %61 = arith.subf %46, %60 : vector<16x32xf32>
    %cst_31 = arith.constant 9.99999996E-13 : f32
    %62 = vector.broadcast %cst_31 : f32 to vector<16x1xf32>
    %63 = arith.addf %59, %62 : vector<16x1xf32>
    %64 = math.rsqrt %63 : vector<16x1xf32>
    %65 = vector.broadcast %64 : vector<16x1xf32> to vector<16x32xf32>
    %66 = arith.mulf %61, %65 : vector<16x32xf32>
    %67 = vector.broadcast %7 : vector<1x32xf32> to vector<16x32xf32>
    %68 = arith.mulf %66, %67 : vector<16x32xf32>
    %69 = vector.broadcast %8 : vector<1x32xf32> to vector<16x32xf32>
    %70 = arith.addf %68, %69 : vector<16x32xf32>
    %cst_32 = arith.constant dense<0.000000e+00> : vector<16x64xf32>
    %71 = tpu.matmul %70, %3, %cst_32 {dimension_numbers = #tpu.dot_dimension_numbers<[1], [0], [0], [1], [0, 0, 1, 1], [], []>} : vector<16x32xf32>, vector<32x64xf32>, vector<16x64xf32> -> vector<16x64xf32>
    %72 = vector.broadcast %9 : vector<1x64xf32> to vector<16x64xf32>
    %73 = arith.addf %71, %72 : vector<16x64xf32>
    %cst_33 = arith.constant 5.000000e-01 : f32
    %74 = vector.broadcast %cst_33 : f32 to vector<16x64xf32>
    %75 = arith.mulf %74, %73 : vector<16x64xf32>
    %cst_34 = arith.constant 1.41421354 : f32
    %76 = vector.broadcast %cst_34 : f32 to vector<16x64xf32>
    %77 = arith.divf %73, %76 : vector<16x64xf32>
    %78 = math.erf %77 : vector<16x64xf32>
    %cst_35 = arith.constant 1.000000e+00 : f32
    %79 = vector.broadcast %cst_35 : f32 to vector<16x64xf32>
    %80 = arith.addf %79, %78 : vector<16x64xf32>
    %81 = arith.mulf %75, %80 : vector<16x64xf32>
    "tpu.trace_start"() <{level = 10 : i32, message = "ri,hi->rh"}> : () -> ()
    %cst_36 = arith.constant dense<0.000000e+00> : vector<16x32xf32>
    %82 = tpu.matmul %81, %4, %cst_36 {dimension_numbers = #tpu.dot_dimension_numbers<[1], [1], [0], [0], [0, 0, 1, 0], [], []>} : vector<16x64xf32>, vector<32x64xf32>, vector<16x32xf32> -> vector<16x32xf32>
    "tpu.trace_stop"() : () -> ()
    %83 = vector.broadcast %10 : vector<1x32xf32> to vector<16x32xf32>
    %84 = arith.addf %82, %83 : vector<16x32xf32>
    %85 = arith.addf %84, %70 : vector<16x32xf32>
    %cst_37 = arith.constant dense<0.000000e+00> : vector<16xf32>
    %86 = vector.multi_reduction <add>, %85, %cst_37 [1] : vector<16x32xf32> to vector<16xf32>
    %87 = vector.shape_cast %86 : vector<16xf32> to vector<16x1xf32>
    %cst_38 = arith.constant 3.200000e+01 : f32
    %88 = vector.broadcast %cst_38 : f32 to vector<16x1xf32>
    %89 = arith.divf %87, %88 : vector<16x1xf32>
    %90 = arith.mulf %85, %85 : vector<16x32xf32>
    %cst_39 = arith.constant dense<0.000000e+00> : vector<16xf32>
    %91 = vector.multi_reduction <add>, %90, %cst_39 [1] : vector<16x32xf32> to vector<16xf32>
    %92 = vector.shape_cast %91 : vector<16xf32> to vector<16x1xf32>
    %cst_40 = arith.constant 3.200000e+01 : f32
    %93 = vector.broadcast %cst_40 : f32 to vector<16x1xf32>
    %94 = arith.divf %92, %93 : vector<16x1xf32>
    %95 = arith.mulf %89, %89 : vector<16x1xf32>
    %96 = arith.subf %94, %95 : vector<16x1xf32>
    %cst_41 = arith.constant 0.000000e+00 : f32
    %97 = vector.broadcast %cst_41 : f32 to vector<16x1xf32>
    %98 = arith.maximumf %96, %97 : vector<16x1xf32>
    %99 = vector.broadcast %89 : vector<16x1xf32> to vector<16x32xf32>
    %100 = arith.subf %85, %99 : vector<16x32xf32>
    %cst_42 = arith.constant 9.99999996E-13 : f32
    %101 = vector.broadcast %cst_42 : f32 to vector<16x1xf32>
    %102 = arith.addf %98, %101 : vector<16x1xf32>
    %103 = math.rsqrt %102 : vector<16x1xf32>
    %104 = vector.broadcast %103 : vector<16x1xf32> to vector<16x32xf32>
    %105 = arith.mulf %100, %104 : vector<16x32xf32>
    %106 = vector.broadcast %11 : vector<1x32xf32> to vector<16x32xf32>
    %107 = arith.mulf %105, %106 : vector<16x32xf32>
    %108 = vector.broadcast %12 : vector<1x32xf32> to vector<16x32xf32>
    %109 = arith.addf %107, %108 : vector<16x32xf32>
    %cst_43 = arith.constant 0.000000e+00 : f32
    %110 = vector.broadcast %cst_43 : f32 to vector<16x96xf32>
    %111 = tpu.concatenate %109, %110 in 1 : vector<16x32xf32>, vector<16x96xf32> -> vector<16x128xf32>
    %c0_44 = arith.constant 0 : index
    %c0_45 = arith.constant 0 : index
    %112 = vector.load %arg4[%c0_44, %c0_45] : memref<16x128xf32, #tpu.memory_space<vmem>>, vector<16x128xf32>
    tpu.vector_store %arg4[%c0_44, %c0_45], %111 {strides = array<i32>} : memref<16x128xf32, #tpu.memory_space<vmem>>, vector<16x128xf32>,
    return
  }
}

</mosaic_0001>

<bundles_post_ra>
// kernel: tpu_custom_call.1
= control target key start
LH: loop header
LB: loop body
LE: loop exit
PB: predicated region body
PF: predicated region fallthrough
CT: control target
= control target key end

     0   :  { %vm45_vm0 = vcmask 261120   ;;  %s1464_s0 = inlined_call_operand.vmem [shape: f32[16,32], index: 0, kind: input, shape index: {}]   ;;  %s1465_s1 = inlined_call_operand.vmem [shape: f32[32,256], index: 1, kind: input, shape index: {}]   ;;  %s1466_s2 = inlined_call_operand.vmem [shape: f32[1,352], index: 2, kind: input, shape index: {}]   ;;  %s1467_s3 = inlined_call_operand.vmem [shape: f32[64,48], index: 3, kind: input, shape index: {}]   ;;  %s1468_s4 = inlined_call_operand.hbm [shape: f32[16,128], index: 4, kind: output, shape index: {}]  }
   0x1   :  { %v1222_v0 = vld [vmem:[%s1465_s1 + $0x30] sm:$0xff]  ;;  %v1227_v1 = vld [vmem:[%s1465_s1 + $0x20] sm:$0xff] }
   0x2   :  { %1036 = vmatprep.subr.mxu0 %v1222_v0  ;;  %v1233_v2 = vld [vmem:[%s1464_s0] sm:$0xff]  ;;  %v1239_v3 = vld [vmem:[%s1465_s1 + $0x10] sm:$0xff] }
   0x3   :  { %1037 = vmatpush3.msra.mxu0 %v1222_v0  ;;  %1044 = vmatprep.mubr.msk.f32.mxu0 %vm45_vm0, %v1233_v2 }
   0x4   :  { %9 = vsyncpa [#allocation3], 0  ;;  %1038 = vmatprep.subr.mxu0 %v1227_v1  ;;  %v1248_v4 = vld [vmem:[%s1465_s1] sm:$0xff]  ;;  %v1255_v5 = vld [vmem:[%s1464_s0 + $0x8] sm:$0xff]  ;;  %s1188_s29 = smov 96   ;;  %vm306_vm1 = vcmask 130048  }
   0x5   :  { %1039 = vmatpush3.msra.mxu0 %v1227_v1  ;;  %v1264_v6 = vld [vmem:[%s1467_s3] sm:$0xff]  ;;  %v1271_v7 = vld [vmem:[%s1467_s3 + $0x8] sm:$0xff]  ;;  %v1278_v8 = vld [vmem:[%s1467_s3 + $0x18] sm:$0xff]  ;;  %s1190_s19 = smov 32   ;;  %vm805_vm2 = vcmask 523264  }
   0x6   :  { %1040 = vmatprep.subr.mxu0 %v1239_v3  ;;  %149 = vrot.lane.b32.xlu1 %v1264_v6, %s1188_s29  ;;  %v1285_v9 = vld [vmem:[%s1467_s3 + $0x28] sm:$0xff]  ;;  %v1292_v10 = vld [vmem:[%s1467_s3 + $0x38] sm:$0xff]  ;;  %v1299_v11 = vld [vmem:[%s1466_s2] ss:$0 sm:$0xff] }
   0x7   :  { %1041 = vmatpush3.msra.mxu0 %v1239_v3  ;;  %v1307_v15 = vld [vmem:[%s1467_s3 + $0x10] sm:$0xff]  ;;  %v1327_v19 = vld [vmem:[%s1467_s3 + $0x20] sm:$0xff] }
   0x8   :  { %1042 = vmatprep.subr.mxu0 %v1248_v4  ;;  %v1334_v20 = vld [vmem:[%s1467_s3 + $0x30] sm:$0xff]  ;;  %s1189_s3 = smov 64  }
   0x9   :  { %1043 = vmatpush3.msra.mxu0 %v1248_v4 }
   0xa   :  { %1045 = vmatmul.mubr.msk.f32.vlgmr.msra.gmra.mxu0 %vm45_vm0, %v1255_v5  ;;  %151 = vrot.lane.b32.xlu1 %v1271_v7, %s1188_s29 }
   0xe   :  { %155 = vrot.lane.b32.xlu1 %v1278_v8, %s1188_s29 }
  0x12   :  { %159 = vrot.lane.b32.xlu1 %v1285_v9, %s1188_s29 }
  0x16   :  { %163 = vrot.lane.b32.xlu1 %v1292_v10, %s1188_s29 }
  0x78   :  { %v150_v29 = vpop.permute.xlu1 %149 }
  0x7c   :  { %v152_v30 = vpop.permute.xlu1 %151 }
  0x80   :  { %v156_v34 = vpop.permute.xlu1 %155 }
  0x84   :  { %v160_v45 = vpop.permute.xlu1 %159 }
  0x88   :  { %v164_v57 = vpop.permute.xlu1 %163 }
  0xca   :  { %v1046_v12 = vpop.f32.mrf.mxu0 }
  0xcb   :  { %v1302_v13 = vadd.f32 %v1046_v12, %v1299_v11 }
  0xcc   :  { %v118_v14 = vpop.f32.mrf.mxu0 }
  0xcd   :  { %v1310_v16 = vadd.f32 %v1299_v11, %v118_v14  ;;  %139 = vrot.lane.b32.xlu0 %v1302_v13, %s1188_s29  ;;  %v128_v23 = vmul.f32 %v1302_v13, %v1271_v7  ;;  %v130_v24 = vmul.f32 %v1302_v13, %v1278_v8  ;;  %v132_v26 = vmul.f32 %v1302_v13, %v1285_v9 }
  0xce   :  { %v134_v28 = vmul.f32 %v1302_v13, %v1292_v10 }
  0xcf   :  { %v127_v17 = vmul.f32 %v1310_v16, %v1264_v6  ;;  %v129_v18 = vmul.f32 %v1310_v16, %v1307_v15  ;;  %v131_v25 = vmul.f32 %v1310_v16, %v1327_v19  ;;  %v133_v27 = vmul.f32 %v1310_v16, %v1334_v20 }
  0xd1   :  { %137 = vrot.lane.b32.xlu0 %v1310_v16, %s1188_s29  ;;  %1051 = vmatprep.mubr.msk.f32.mxu0 %vm45_vm0, %v127_v17 }
  0xd2   :  { %1054 = vmatprep.mubr.msk.f32.mxu1 %vm45_vm0, %v129_v18 }
  0xd5   :  { %153 = vrot.lane.b32.xlu0 %v1307_v15, %s1188_s29 }
  0xd9   :  { %157 = vrot.lane.b32.xlu0 %v1327_v19, %s1188_s29 }
  0xdd   :  { %161 = vrot.lane.b32.xlu0 %v1334_v20, %s1188_s29 }
 0x13f   :  { %v140_v21 = vpop.permute.xlu0 %139 }
 0x140   :  { %1047 = vmatprep.subr.msk.mxu0 %vm45_vm0, %v140_v21  ;;  %1112 = vmatprep.subr.msk.mxu1 %vm45_vm0, %v140_v21 }
 0x141   :  { %1048 = vmatpush3.xpose.msk.msra.mxu0 %vm45_vm0, %v140_v21  ;;  %1114 = vmatpush3.xpose.msk.msra.mxu1 %vm45_vm0, %v140_v21 }
 0x143   :  { %v138_v22 = vpop.permute.xlu0 %137 }
 0x144   :  { %1049 = vmatprep.subr.msk.mxu0 %vm45_vm0, %v138_v22  ;;  %1113 = vmatprep.subr.msk.mxu1 %vm45_vm0, %v138_v22 }
 0x145   :  { %1050 = vmatpush3.xpose.msk.msra.mxu0 %vm45_vm0, %v138_v22  ;;  %1115 = vmatpush3.xpose.msk.msra.mxu1 %vm45_vm0, %v138_v22 }
 0x147   :  { %v154_v31 = vpop.permute.xlu0 %153 }
 0x148   :  { %1052 = vmatmul.mubr.msk.f32.vlgmr.msra.gmra.mxu0 %vm45_vm0, %v128_v23  ;;  %1055 = vmatmul.mubr.msk.f32.vlgmr.msra.gmra.mxu1 %vm45_vm0, %v130_v24 }
 0x149   :  { %1057 = vmatprep.mubr.msk.f32.mxu1 %vm45_vm0, %v131_v25 }
 0x14b   :  { %v158_v36 = vpop.permute.xlu0 %157 }
 0x14c   :  { %1058 = vmatmul.mubr.msk.f32.gmra.mxu1 %vm45_vm0, %v132_v26 }
 0x14d   :  { %1060 = vmatprep.mubr.msk.f32.mxu1 %vm45_vm0, %v133_v27 }
 0x14f   :  { %v162_v48 = vpop.permute.xlu0 %161 }
 0x150   :  { %1061 = vmatmul.mubr.msk.f32.gmra.mxu1 %vm45_vm0, %v134_v28 }
 0x208   :  { %v1053_v32 = vpop.f32.mrf.mxu0  ;;  %v1056_v33 = vpop.f32.mrf.mxu1 }
 0x209   :  { %v273_v35 = vadd.f32 %v1053_v32, %v152_v30  ;;  %v283_v49 = vadd.f32 %v1056_v33, %v156_v34 }
 0x20a   :  { %v267_v37 = vpop.f32.mrf.mxu0  ;;  %v277_v38 = vpop.f32.mrf.mxu1 }
 0x20b   :  { %v268_v39 = vadd.f32 %v267_v37, %v150_v29  ;;  %v310_v40 = vsel %vm306_vm1, %v273_v35, -inf  ;;  %v278_v42 = vadd.f32 %v277_v38, %v154_v31  ;;  %v316_v56 = vsel %vm306_vm1, %v283_v49, -inf }
 0x20c   :  { %v1059_v41 = vpop.f32.mrf.mxu1  ;;  %311 = vmax.xlane.f32.xlu1 %v310_v40 }
 0x20d   :  { %v307_v43 = vsel %vm306_vm1, %v268_v39, -inf  ;;  %v313_v51 = vsel %vm306_vm1, %v278_v42, -inf  ;;  %v293_v54 = vadd.f32 %v1059_v41, %v160_v45 }
 0x20e   :  { %v287_v44 = vpop.f32.mrf.mxu1  ;;  %308 = vmax.xlane.f32.xlu0 %v307_v43 }
 0x20f   :  { %v288_v46 = vadd.f32 %v287_v44, %v158_v36  ;;  %v322_v59 = vsel %vm306_vm1, %v293_v54, -inf }
 0x210   :  { %v1062_v47 = vpop.f32.mrf.mxu1 }
 0x211   :  { %v319_v50 = vsel %vm306_vm1, %v288_v46, -inf  ;;  %v303_v58 = vadd.f32 %v1062_v47, %v164_v57 }
 0x212   :  { %v297_v52 = vpop.f32.mrf.mxu1  ;;  %320 = vmax.xlane.f32.xlu1 %v319_v50  ;;  %314 = vmax.xlane.f32.xlu0 %v313_v51 }
 0x213   :  { %v298_v53 = vadd.f32 %v297_v52, %v162_v48  ;;  %v328_v60 = vsel %vm306_vm1, %v303_v58, -inf }
 0x215   :  { %v325_v55 = vsel %vm306_vm1, %v298_v53, -inf }
 0x216   :  { %326 = vmax.xlane.f32.xlu1 %v325_v55  ;;  %317 = vmax.xlane.f32.xlu0 %v316_v56 }
 0x21a   :  { %323 = vmax.xlane.f32.xlu0 %v322_v59 }
 0x21e   :  { %329 = vmax.xlane.f32.xlu0 %v328_v60 }
 0x295   :  { %v312_v61 = vpop.xlane.xlu1 %311 }
 0x296   :  { %v332_v62 = vsub.f32 %v273_v35, %v312_v61 }
 0x297   :  { %v309_v63 = vpop.xlane.xlu0 %308 }
 0x298   :  { %v341_v12 = vmul.f32 1.442695, %v332_v62  ;;  %v331_v14 = vsub.f32 %v268_v39, %v309_v63 }
 0x29a   :  { %1122 = vpow2.f32 %v341_v12  ;;  %v339_v17 = vmul.f32 1.442695, %v331_v14 }
 0x29b   :  { %v321_v18 = vpop.xlane.xlu1 %320  ;;  %v315_v21 = vpop.xlane.xlu0 %314 }
 0x29c   :  { %1124 = vpow2.f32 %v339_v17  ;;  %v335_v22 = vsub.f32 %v288_v46, %v321_v18  ;;  %v333_v23 = vsub.f32 %v278_v42, %v315_v21 }
 0x29e   :  { %v343_v24 = vmul.f32 1.442695, %v333_v23  ;;  %v347_v25 = vmul.f32 1.442695, %v335_v22 }
 0x29f   :  { %v327_v26 = vpop.xlane.xlu1 %326  ;;  %v318_v27 = vpop.xlane.xlu0 %317 }
 0x2a0   :  { %v337_v28 = vsub.f32 %v298_v53, %v327_v26  ;;  %v334_v29 = vsub.f32 %v283_v49, %v318_v27  ;;  %1126 = vpow2.f32 %v343_v24 }
 0x2a1   :  { %1128 = vpow2.f32 %v347_v25 }
 0x2a2   :  { %v345_v30 = vmul.f32 1.442695, %v334_v29  ;;  %v351_v31 = vmul.f32 1.442695, %v337_v28 }
 0x2a3   :  { %v324_v32 = vpop.xlane.xlu0 %323 }
 0x2a4   :  { %v336_v33 = vsub.f32 %v293_v54, %v324_v32  ;;  %1130 = vpow2.f32 %v345_v30 }
 0x2a5   :  { %1132 = vpow2.f32 %v351_v31 }
 0x2a6   :  { %v349_v34 = vmul.f32 1.442695, %v336_v33 }
 0x2a7   :  { %v1372_v35 = vpop.eup %1122  ;;  %v330_v36 = vpop.xlane.xlu0 %329 }
 0x2a8   :  { %1134 = vpow2.f32 %v349_v34  ;;  %v338_v37 = vsub.f32 %v303_v58, %v330_v36  ;;  %v358_v38 = vsel %vm306_vm1, %v1372_v35, 0.0 }
 0x2a9   :  { %v1125_v39 = vpop.eup %1124  ;;  %359 = vadd.xlane.f32.xlu0 %v358_v38 }
 0x2aa   :  { %v353_v40 = vmul.f32 1.442695, %v338_v37  ;;  %v355_v41 = vsel %vm306_vm1, %v1125_v39, 0.0 }
 0x2ab   :  { %356 = vadd.xlane.f32.xlu1 %v355_v41 }
 0x2ac   :  { %1136 = vpow2.f32 %v353_v40 }
 0x2ad   :  { %v1127_v42 = vpop.eup %1126 }
 0x2ae   :  { %v361_v43 = vsel %vm306_vm1, %v1127_v42, 0.0  ;;  %v1129_v44 = vpop.eup %1128 }
 0x2af   :  { %362 = vadd.xlane.f32.xlu1 %v361_v43  ;;  %v367_v46 = vsel %vm306_vm1, %v1129_v44, 0.0 }
 0x2b1   :  { %v1131_v45 = vpop.eup %1130 }
 0x2b2   :  { %v364_v47 = vsel %vm306_vm1, %v1131_v45, 0.0  ;;  %v1133_v48 = vpop.eup %1132 }
 0x2b3   :  { %368 = vadd.xlane.f32.xlu1 %v367_v46  ;;  %365 = vadd.xlane.f32.xlu0 %v364_v47  ;;  %v373_v51 = vsel %vm306_vm1, %v1133_v48, 0.0 }
 0x2b5   :  { %v1135_v49 = vpop.eup %1134 }
 0x2b6   :  { %v370_v50 = vsel %vm306_vm1, %v1135_v49, 0.0 }
 0x2b7   :  { %374 = vadd.xlane.f32.xlu1 %v373_v51  ;;  %371 = vadd.xlane.f32.xlu0 %v370_v50 }
 0x2b9   :  { %v1137_v52 = vpop.eup %1136 }
 0x2ba   :  { %v376_v53 = vsel %vm306_vm1, %v1137_v52, 0.0 }
 0x2bb   :  { %377 = vadd.xlane.f32.xlu0 %v376_v53 }
 0x2c8   :  { %397 = vrot.lane.b32.xlu1 %v1302_v13, %s1189_s3 }
 0x2cc   :  { %554 = vrot.lane.b32.xlu1 %v1222_v0, %s1190_s19 }
 0x2d0   :  { %552 = vrot.lane.b32.xlu1 %v1227_v1, %s1190_s19 }
 0x2d1   :  { %395 = vrot.lane.b32.xlu0 %v1310_v16, %s1189_s3 }
 0x2d4   :  { %548 = vrot.lane.b32.xlu1 %v1248_v4, %s1190_s19 }
 0x2d5   :  { %550 = vrot.lane.b32.xlu0 %v1239_v3, %s1190_s19 }
 0x2d9   :  { %560 = vrot.lane.b32.xlu0 %v1299_v11, %s1190_s19 }
 0x332   :  { %v360_v55 = vpop.xlane.xlu0 %359 }
 0x334   :  { %v357_v54 = vpop.xlane.xlu1 %356 }
 0x335   :  { %1138 = vrcp.f32 %v357_v54 }
 0x336   :  { %1140 = vrcp.f32 %v360_v55 }
 0x338   :  { %v363_v56 = vpop.xlane.xlu1 %362 }
 0x339   :  { %1142 = vrcp.f32 %v363_v56 }
 0x33c   :  { %v369_v13 = vpop.xlane.xlu1 %368  ;;  %v366_v57 = vpop.xlane.xlu0 %365 }
 0x33d   :  { %1144 = vrcp.f32 %v369_v13  ;;  %v26_v13 = vld [vmem:[%s1465_s1 + $0x28] sm:$0xff] }
 0x33e   :  { %1146 = vrcp.f32 %v366_v57  ;;  %v25_v57 = vld [vmem:[%s1465_s1 + $0x18] sm:$0xff] }
 0x340   :  { %v375_v16 = vpop.xlane.xlu1 %374  ;;  %v372_v0 = vpop.xlane.xlu0 %371 }
 0x341   :  { %1148 = vrcp.f32 %v375_v16  ;;  %v24_v16 = vld [vmem:[%s1465_s1 + $0x8] sm:$0xff] }
 0x342   :  { %v1139_v58 = vpop.eup %1138  ;;  %1150 = vrcp.f32 %v372_v0 }
 0x343   :  { %v380_v1 = vmul.f32 %v1139_v58, %v1125_v39  ;;  %v1141_v4 = vpop.eup %1140 }
 0x344   :  { %v398_v3 = vpop.permute.xlu1 %397  ;;  %v378_v11 = vpop.xlane.xlu0 %377  ;;  %v382_v61 = vmul.f32 %v1141_v4, %v1372_v35 }
 0x345   :  { %1067 = vmatprep.mubr.msk.f32.mxu0 %vm306_vm1, %v380_v1  ;;  %1152 = vrcp.f32 %v378_v11  ;;  %1063 = vmatprep.subr.mxu0 %v398_v3 }
 0x346   :  { %1064 = vmatpush3.msra.mxu0 %v398_v3  ;;  %v1143_v59 = vpop.eup %1142 }
 0x347   :  { %v384_v63 = vmul.f32 %v1143_v59, %v1127_v42 }
 0x348   :  { %v396_v60 = vpop.permute.xlu0 %395  ;;  %v555_v26 = vpop.permute.xlu1 %554 }
 0x349   :  { %1065 = vmatprep.subr.mxu0 %v396_v60  ;;  %1079 = vmatprep.subr.mxu1 %v555_v26 }
 0x34a   :  { %v1145_v62 = vpop.eup %1144  ;;  %1066 = vmatpush3.msra.mxu0 %v396_v60  ;;  %1080 = vmatpush3.msra.mxu1 %v555_v26 }
 0x34b   :  { %v1147_v12 = vpop.eup %1146  ;;  %1068 = vmatmul.mubr.msk.f32.vlgmr.msra.gmra.mxu0 %vm306_vm1, %v382_v61  ;;  %v388_v18 = vmul.f32 %v1145_v62, %v1129_v44 }
 0x34c   :  { %1070 = vmatprep.mubr.msk.f32.mxu0 %vm306_vm1, %v384_v63  ;;  %v386_v14 = vmul.f32 %v1147_v12, %v1131_v45  ;;  %v553_v27 = vpop.permute.xlu1 %552  ;;  %v551_v28 = vpop.permute.xlu0 %550 }
 0x34d   :  { %1081 = vmatprep.subr.mxu1 %v553_v27 }
 0x34e   :  { %v1149_v17 = vpop.eup %1148  ;;  %1082 = vmatpush3.msra.mxu1 %v553_v27 }
 0x34f   :  { %v1151_v21 = vpop.eup %1150  ;;  %1071 = vmatmul.mubr.msk.f32.gmra.mxu0 %vm306_vm1, %v386_v14  ;;  %v392_v24 = vmul.f32 %v1149_v17, %v1133_v48  ;;  %1083 = vmatprep.subr.mxu1 %v551_v28 }
 0x350   :  { %1073 = vmatprep.mubr.msk.f32.mxu0 %vm306_vm1, %v388_v18  ;;  %v390_v22 = vmul.f32 %v1151_v21, %v1135_v49  ;;  %1084 = vmatpush3.msra.mxu1 %v551_v28  ;;  %v549_v29 = vpop.permute.xlu1 %548 }
 0x351   :  { %1085 = vmatprep.subr.mxu1 %v549_v29 }
 0x352   :  { %v1153_v23 = vpop.eup %1152  ;;  %1086 = vmatpush3.msra.mxu1 %v549_v29 }
 0x353   :  { %1074 = vmatmul.mubr.msk.f32.gmra.mxu0 %vm306_vm1, %v390_v22  ;;  %v394_v25 = vmul.f32 %v1153_v23, %v1137_v52 }
 0x354   :  { %1076 = vmatprep.mubr.msk.f32.mxu0 %vm306_vm1, %v392_v24 }
 0x357   :  { %1077 = vmatmul.mubr.msk.f32.gmra.mxu0 %vm306_vm1, %v394_v25 }
 0x40b   :  { %v1069_v30 = vpop.f32.mrf.mxu0 }
 0x40c   :  { %v531_v45 = vmul.f32 %v1069_v30, %v1271_v7 }
 0x40d   :  { %v491_v31 = vpop.f32.mrf.mxu0 }
 0x40e   :  { %v530_v42 = vmul.f32 %v491_v31, %v1264_v6 }
 0x40f   :  { %v1072_v32 = vpop.f32.mrf.mxu0 }
 0x410   :  { %v533_v39 = vmul.f32 %v1072_v32, %v1278_v8  ;;  %v561_v8 = vpop.permute.xlu0 %560 }
 0x411   :  { %v501_v33 = vpop.f32.mrf.mxu0 }
 0x412   :  { %v532_v37 = vmul.f32 %v501_v33, %v1307_v15  ;;  %v539_v49 = vadd.f32 %v533_v39, %v531_v45 }
 0x413   :  { %v1075_v34 = vpop.f32.mrf.mxu0 }
 0x414   :  { %v535_v40 = vmul.f32 %v1075_v34, %v1285_v9  ;;  %v538_v47 = vadd.f32 %v532_v37, %v530_v42 }
 0x415   :  { %v511_v35 = vpop.f32.mrf.mxu0 }
 0x416   :  { %v534_v43 = vmul.f32 %v511_v35, %v1327_v19 }
 0x417   :  { %v1078_v36 = vpop.f32.mrf.mxu0 }
 0x418   :  { %v537_v38 = vmul.f32 %v1078_v36, %v1292_v10 }
 0x419   :  { %v521_v41 = vpop.f32.mrf.mxu0 }
 0x41a   :  { %v536_v44 = vmul.f32 %v521_v41, %v1334_v20  ;;  %v541_v46 = vadd.f32 %v537_v38, %v535_v40 }
 0x41c   :  { %v540_v48 = vadd.f32 %v536_v44, %v534_v43  ;;  %v543_v50 = vadd.f32 %v541_v46, %v539_v49 }
 0x41e   :  { %v542_v15 = vadd.f32 %v540_v48, %v538_v47 }
 0x420   :  { %1087 = vmatprep.mubr.msk.f32.mxu1 %vm45_vm0, %v542_v15 }
 0x421   :  { %1088 = vmatmul.mubr.msk.f32.vlgmr.msra.gmra.mxu1 %vm45_vm0, %v543_v50 }
 0x4e1   :  { %v1089_v9 = vpop.f32.mrf.mxu1 }
 0x4e2   :  { %v641_v10 = vadd.f32 %v1089_v9, %v561_v8 }
 0x4e3   :  { %v635_v6 = vpop.f32.mrf.mxu1 }
 0x4e4   :  { %v645_v19 = vadd.f32 %v641_v10, %v1255_v5  ;;  %v636_v51 = vadd.f32 %v635_v6, %v561_v8  ;;  %v982_v5 = vld [vmem:[%s1466_s2 + $0x1] ss:$0 sm:$0xff]  ;;  %v985_v8 = vld [vmem:[%s1466_s2 + $0x2] ss:$0 sm:$0xff]  ;;  %s1191_s2 = smov [#allocation2]  }
 0x4e6   :  { %v644_v20 = vadd.f32 %v636_v51, %v1233_v2  ;;  %v649_v7 = vsel %vm45_vm0, %v645_v19, 0.0  ;;  %v656_v54 = vmul.f32 %v645_v19, %v645_v19  ;;  %v27_v2 = vld [vmem:[%s1465_s1 + $0x38] sm:$0xff] }
 0x4e7   :  { %650 = vadd.xlane.f32.xlu0 %v649_v7  ;;  %1090 = vmatprep.subr.mxu0 %v27_v2 }
 0x4e8   :  { %v646_v52 = vsel %vm45_vm0, %v644_v20, 0.0  ;;  %v655_v53 = vmul.f32 %v644_v20, %v644_v20  ;;  %v660_v56 = vsel %vm45_vm0, %v656_v54, 0.0  ;;  %1091 = vmatpush3.msra.mxu0 %v27_v2 }
 0x4e9   :  { %647 = vadd.xlane.f32.xlu1 %v646_v52  ;;  %1092 = vmatprep.subr.mxu0 %v26_v13 }
 0x4ea   :  { %v657_v55 = vsel %vm45_vm0, %v655_v53, 0.0  ;;  %1093 = vmatpush3.msra.mxu0 %v26_v13 }
 0x4eb   :  { %658 = vadd.xlane.f32.xlu0 %v657_v55  ;;  %1094 = vmatprep.subr.mxu0 %v25_v57 }
 0x4ec   :  { %1095 = vmatpush3.msra.mxu0 %v25_v57 }
 0x4ed   :  { %661 = vadd.xlane.f32.xlu1 %v660_v56  ;;  %1096 = vmatprep.subr.mxu0 %v24_v16 }
 0x4ee   :  { %1097 = vmatpush3.msra.mxu0 %v24_v16 }
 0x4fe   :  { %692 = vrot.lane.b32.xlu1 %v982_v5, %s1189_s3 }
 0x501   :  { %687 = vrot.lane.b32.xlu0 %v982_v5, %s1188_s29 }
 0x502   :  { %803 = vrot.lane.b32.xlu1 %v27_v2, %s1189_s3 }
 0x505   :  { %801 = vrot.lane.b32.xlu0 %v26_v13, %s1189_s3 }
 0x506   :  { %799 = vrot.lane.b32.xlu1 %v25_v57, %s1189_s3 }
 0x509   :  { %797 = vrot.lane.b32.xlu0 %v24_v16, %s1189_s3 }
 0x570   :  { %v651_v0 = vpop.xlane.xlu0 %650 }
 0x571   :  { %v654_v1 = vmul.f32 0.03125, %v651_v0 }
 0x572   :  { %v648_v58 = vpop.xlane.xlu1 %647 }
 0x573   :  { %v653_v3 = vmul.f32 0.03125, %v648_v58  ;;  %v666_v61 = vmul.f32 %v654_v1, %v654_v1  ;;  %v672_v24 = vsub.f32 %v645_v19, %v654_v1 }
 0x574   :  { %v659_v11 = vpop.xlane.xlu0 %658 }
 0x575   :  { %v665_v4 = vmul.f32 %v653_v3, %v653_v3  ;;  %v663_v59 = vmul.f32 0.03125, %v659_v11  ;;  %v671_v22 = vsub.f32 %v644_v20, %v653_v3 }
 0x576   :  { %v662_v60 = vpop.xlane.xlu1 %661 }
 0x577   :  { %v667_v62 = vsub.f32 %v663_v59, %v665_v4  ;;  %v664_v63 = vmul.f32 0.03125, %v662_v60 }
 0x578   :  { %v688_v27 = vpop.permute.xlu0 %687 }
 0x579   :  { %v669_v12 = vmax.f32 %v667_v62, 0.0  ;;  %v668_v14 = vsub.f32 %v664_v63, %v666_v61 }
 0x57a   :  { %v693_v33 = vpop.permute.xlu1 %692 }
 0x57b   :  { %v673_v17 = vadd.f32 1e-12, %v669_v12  ;;  %v670_v18 = vmax.f32 %v668_v14, 0.0 }
 0x57c   :  { %v802_v35 = vpop.permute.xlu0 %801 }
 0x57d   :  { %1154 = vrsqrt.f32 %v673_v17  ;;  %v674_v21 = vadd.f32 1e-12, %v670_v18 }
 0x57e   :  { %v804_v34 = vpop.permute.xlu1 %803 }
 0x57f   :  { %1156 = vrsqrt.f32 %v674_v21  ;;  %1101 = vmatprep.subr.msk.mxu1 %vm805_vm2, %v804_v34 }
 0x580   :  { %1102 = vmatpush3.xpose.msk.msra.mxu1 %vm805_vm2, %v804_v34  ;;  %v798_v37 = vpop.permute.xlu0 %797 }
 0x581   :  { %1103 = vmatprep.subr.msk.mxu1 %vm805_vm2, %v802_v35 }
 0x582   :  { %v800_v36 = vpop.permute.xlu1 %799 }
 0x584   :  { %1104 = vmatpush3.xpose.msk.msra.mxu1 %vm805_vm2, %v802_v35 }
 0x585   :  { %1105 = vmatprep.subr.msk.mxu1 %vm805_vm2, %v800_v36 }
 0x588   :  { %1106 = vmatpush3.xpose.msk.msra.mxu1 %vm805_vm2, %v800_v36 }
 0x589   :  { %1107 = vmatprep.subr.msk.mxu1 %vm805_vm2, %v798_v37 }
 0x58a   :  { %v1155_v23 = vpop.eup %1154 }
 0x58b   :  { %v677_v25 = vmul.f32 %v1155_v23, %v671_v22 }
 0x58c   :  { %v1157_v26 = vpop.eup %1156  ;;  %1108 = vmatpush3.xpose.msk.msra.mxu1 %vm805_vm2, %v798_v37 }
 0x58d   :  { %v678_v28 = vmul.f32 %v1157_v26, %v672_v24  ;;  %v685_v29 = vmul.f32 %v982_v5, %v677_v25 }
 0x58f   :  { %v686_v30 = vmul.f32 %v982_v5, %v678_v28  ;;  %v690_v31 = vadd.f32 %v688_v27, %v685_v29 }
 0x591   :  { %v691_v32 = vadd.f32 %v688_v27, %v686_v30  ;;  %1098 = vmatprep.mubr.msk.f32.mxu0 %vm45_vm0, %v690_v31 }
 0x593   :  { %1099 = vmatmul.mubr.msk.f32.vlgmr.msra.gmra.mxu0 %vm45_vm0, %v691_v32 }
 0x653   :  { %v1100_v38 = vpop.f32.mrf.mxu0 }
 0x654   :  { %v773_v39 = vadd.f32 %v1100_v38, %v693_v33 }
 0x655   :  { %v767_v40 = vpop.f32.mrf.mxu0 }
 0x656   :  { %v780_v41 = vmul.f32 0.70710677, %v773_v39  ;;  %v768_v42 = vadd.f32 %v767_v40, %v693_v33  ;;  %v777_v49 = vmul.f32 0.5, %v773_v39 }
 0x658   :  { %1158 = verf.f32 %v780_v41  ;;  %v779_v43 = vmul.f32 0.70710677, %v768_v42  ;;  %v776_v47 = vmul.f32 0.5, %v768_v42 }
 0x65a   :  { %1160 = verf.f32 %v779_v43 }
 0x665   :  { %v1159_v44 = vpop.eup %1158 }
 0x666   :  { %v784_v46 = vadd.f32 1.0, %v1159_v44 }
 0x667   :  { %v1161_v45 = vpop.eup %1160 }
 0x668   :  { %v783_v48 = vadd.f32 1.0, %v1161_v45  ;;  %v786_v50 = vmul.f32 %v784_v46, %v777_v49 }
 0x66a   :  { %v785_v15 = vmul.f32 %v783_v48, %v776_v47 }
 0x66c   :  { %1109 = vmatprep.mubr.msk.f32.mxu1 %vm805_vm2, %v785_v15 }
 0x66d   :  { %1110 = vmatmul.mubr.msk.f32.vlgmr.msra.gmra.mxu1 %vm805_vm2, %v786_v50 }
 0x72d   :  { %v1111_v9 = vpop.f32.mrf.mxu1 }
 0x72e   :  { %v892_v10 = vadd.f32 %v1111_v9, %v985_v8 }
 0x72f   :  { %v886_v6 = vpop.f32.mrf.mxu1 }
 0x730   :  { %v896_v19 = vadd.f32 %v892_v10, %v691_v32  ;;  %v887_v51 = vadd.f32 %v985_v8, %v886_v6 }
 0x732   :  { %v895_v20 = vadd.f32 %v887_v51, %v690_v31  ;;  %v900_v7 = vsel %vm45_vm0, %v896_v19, 0.0  ;;  %v906_v54 = vmul.f32 %v896_v19, %v896_v19 }
 0x733   :  { %901 = vadd.xlane.f32.xlu0 %v900_v7 }
 0x734   :  { %v897_v52 = vsel %vm45_vm0, %v895_v20, 0.0  ;;  %v905_v53 = vmul.f32 %v895_v20, %v895_v20  ;;  %v910_v56 = vsel %vm45_vm0, %v906_v54, 0.0 }
 0x735   :  { %898 = vadd.xlane.f32.xlu1 %v897_v52 }
 0x736   :  { %v907_v55 = vsel %vm45_vm0, %v905_v53, 0.0 }
 0x737   :  { %908 = vadd.xlane.f32.xlu0 %v907_v55 }
 0x739   :  { %911 = vadd.xlane.f32.xlu1 %v910_v56 }
 0x74a   :  { %934 = vrot.lane.b32.xlu1 %v985_v8, %s1189_s3 }
 0x74d   :  { %929 = vrot.lane.b32.xlu0 %v985_v8, %s1188_s29  ;;  %s948_s29 = sshll.u32 %s1191_s2, 4  ;;  %s949_s29 = int_to_ptr.vmem [resolvable:$true] %s948_s29 }
 0x74e   :  { %s1166_s0 = scalar_lea.vmem %s949_s29, 256  ;;  %p1171_p1 = scmp.lt.s32.totalorder %s949_s29, %s949_s29 }
 0x74f   :  { %p1167_p0 = scmp.ne.s32.totalorder %s949_s29, %s1166_s0  ;;  %p1172_p2 = scmp.lt.s32.totalorder %s1166_s0, %s1166_s0 }
 0x751   :  { %p1173_p3 = por %p1172_p2, %p1171_p1 }
 0x753   :  { %p1174_p4 = pnand %p1173_p3, %p1167_p0 }
 0x7bc   :  { %v902_v5 = vpop.xlane.xlu0 %901 }
 0x7bd   :  { %v904_v13 = vmul.f32 0.03125, %v902_v5 }
 0x7be   :  { %v899_v2 = vpop.xlane.xlu1 %898 }
 0x7bf   :  { %v903_v57 = vmul.f32 0.03125, %v899_v2  ;;  %v916_v3 = vmul.f32 %v904_v13, %v904_v13  ;;  %v922_v18 = vsub.f32 %v896_v19, %v904_v13 }
 0x7c0   :  { %v909_v16 = vpop.xlane.xlu0 %908 }
 0x7c1   :  { %v915_v0 = vmul.f32 %v903_v57, %v903_v57  ;;  %v913_v58 = vmul.f32 0.03125, %v909_v16  ;;  %v921_v12 = vsub.f32 %v895_v20, %v903_v57 }
 0x7c2   :  { %v912_v1 = vpop.xlane.xlu1 %911 }
 0x7c3   :  { %v917_v11 = vsub.f32 %v913_v58, %v915_v0  ;;  %v914_v4 = vmul.f32 0.03125, %v912_v1 }
 0x7c4   :  { %v930_v17 = vpop.permute.xlu0 %929 }
 0x7c5   :  { %v919_v59 = vmax.f32 %v917_v11, 0.0  ;;  %v918_v60 = vsub.f32 %v914_v4, %v916_v3 }
 0x7c6   :  { %v935_v23 = vpop.permute.xlu1 %934 }
 0x7c7   :  { %v923_v61 = vadd.f32 1e-12, %v919_v59  ;;  %v920_v62 = vmax.f32 %v918_v60, 0.0 }
 0x7c9   :  { %1162 = vrsqrt.f32 %v923_v61  ;;  %v924_v63 = vadd.f32 1e-12, %v920_v62 }
 0x7cb   :  { %1164 = vrsqrt.f32 %v924_v63 }
 0x7d6   :  { %v1163_v14 = vpop.eup %1162 }
 0x7d7   :  { %v927_v21 = vmul.f32 %v1163_v14, %v921_v12 }
 0x7d8   :  { %v1165_v22 = vpop.eup %1164 }
 0x7d9   :  { %v928_v24 = vmul.f32 %v1165_v22, %v922_v18  ;;  %v932_v25 = vmul.f32 %v930_v17, %v927_v21 }
 0x7db   :  { %v933_v26 = vmul.f32 %v930_v17, %v928_v24  ;;  %v937_v27 = vadd.f32 %v935_v23, %v932_v25 }
 0x7dd   :  { %v938_v28 = vadd.f32 %v935_v23, %v933_v26  ;;  %v939_v29 = vsel %vm45_vm0, %v937_v27, 0.0 }
 0x7de   :  { %941 = vst [vmem:[#allocation2] sm:$0xff] %v939_v29 }
 0x7df   :  { %v940_v30 = vsel %vm45_vm0, %v938_v28, 0.0 }
 0x7e0   :  { %942 = vst [vmem:[#allocation2 + $0x8] sm:$0xff] %v940_v30 }
 0x7e1   :  { %1177 = shalt.err (!%p1174_p4)
}
 0x7e2   :  { %s1192_s6 = smov 128   ;;  %s1193_s7 = smov 8  }
 0x7e3   :  { %954 = dma.vmem_to_hbm [thread:$0]  %s949_s29, 256, %s1468_s4, [#allocation3], %s1192_s6, %s1192_s6, %s1193_s7  }
 0x7e4   :  { %1186 = dma.done.wait [#allocation3], 256  }
 0x7e5   :  { %1187 = vsyncadd [#allocation3], 4294967040 }
 0x7e6   :  { %958 = vsyncpa [#allocation3], 1 }

</bundles_post_ra>
